<compile_context>
chip_gen: v6e
topology: v6e:2x2x1
jax: 0.10.0
libtpu: 0.0.40
codegen_flags: <defaults>
</compile_context>

<pallas_src>
import math
import functools

import jax
import jax.numpy as jnp
from jax.experimental import pallas as pl
from jax.experimental.pallas import tpu as pltpu

LANE = 128
SUBLANE = 8


def qd_kernel(zd_ref, w_ref, b_ref, o_ref):
    # relu (VPU) -> single MXU matmul (f32 accumulate) -> bias add ->
    # lane-dense store into the 128-wide padded output block.
    h = jnp.maximum(zd_ref[...], 0.0)
    acc = jnp.dot(h, w_ref[...], preferred_element_type=jnp.float32)
    o_ref[...] = (acc + b_ref[...]).astype(o_ref.dtype)


def init_params(key, d_dim, zd_dim):
    # Matches the PyTorch module: xavier_uniform_ on fc1.weight ([d_dim, zd_dim]),
    # bias zeroed.
    bound = math.sqrt(6.0 / (d_dim + zd_dim))
    weight = jax.random.uniform(key, (d_dim, zd_dim), jnp.float32,
                                minval=-bound, maxval=bound)
    bias = jnp.zeros((d_dim,), jnp.float32)
    return weight, bias


def prepare_params(weight, bias, lane=LANE):
    """One-time parameter prep (NOT per forward call).

    Transposes the PyTorch [d_dim, zd_dim] weight to [zd_dim, d_pad] and pads
    the output-feature dim up to a multiple of 128 lanes so the kernel's
    matmul RHS / output are lane-dense. Padded columns are zero, so the extra
    output lanes are exactly zero and are sliced off in the wrapper.
    """
    d_dim, zd_dim = weight.shape
    d_pad = max(lane, ((d_dim + lane - 1) // lane) * lane)
    w_p = jnp.zeros((zd_dim, d_pad), weight.dtype).at[:, :d_dim].set(weight.T)
    b_p = jnp.zeros((1, d_pad), bias.dtype).at[0, :d_dim].set(bias)
    return w_p, b_p, d_dim


@functools.partial(jax.jit, static_argnames=("d_dim", "block_b"))
def qd_forward(zd, w_pad, b_pad, *, d_dim, block_b=512):
    """zd: [B, zd_dim] f32; w_pad: [zd_dim, d_pad]; b_pad: [1, d_pad]."""
    B, zd_dim = zd.shape
    d_pad = w_pad.shape[1]

    # Sublane-aligned batch tile; grid iterates (or megacore-shards) over it.
    bb = min(block_b, B)
    bb = max(SUBLANE, ((bb + SUBLANE - 1) // SUBLANE) * SUBLANE)
    grid = (pl.cdiv(B, bb),)

    out_pad = pl.pallas_call(
        qd_kernel,
        out_shape=jax.ShapeDtypeStruct((B, d_pad), zd.dtype),
        grid_spec=pltpu.PrefetchScalarGridSpec(
            num_scalar_prefetch=0,
            grid=grid,
            in_specs=[
                # zd: tiled over the batch axis.
                pl.BlockSpec((bb, zd_dim), lambda i: (i, 0)),
                # weight / bias: VMEM-resident across all grid steps.
                pl.BlockSpec((zd_dim, d_pad), lambda i: (0, 0)),
                pl.BlockSpec((1, d_pad), lambda i: (0, 0)),
            ],
            out_specs=pl.BlockSpec((bb, d_pad), lambda i: (i, 0)),
        ),
        compiler_params=pltpu.CompilerParams(
            # Independent batch tiles -> shard across TensorCores on v7x.
            dimension_semantics=("parallel",),
        ),
    )(zd, w_pad, b_pad)

    # Un-pad back to the true output width (cheap wrapper-side slice).
    return out_pad[:, :d_dim]


if __name__ == "__main__":
    # Small shapes consistent with the module: zd_dim=32 latent, d_dim=16 domains.
    B, zd_dim, d_dim = 8, 32, 16

    key = jax.random.PRNGKey(0)
    k_w, k_x = jax.random.split(key)
    weight, bias = init_params(k_w, d_dim, zd_dim)        # PyTorch layout
    w_pad, b_pad, d_dim = prepare_params(weight, bias)    # one-time prep
    zd = jax.random.normal(k_x, (B, zd_dim), jnp.float32)

    out = qd_forward(zd, w_pad, b_pad, d_dim=d_dim)
    out = jax.block_until_ready(out)

    # Reference check in plain JAX (relu -> linear), against the original params.
    ref = jnp.maximum(zd, 0.0) @ weight.T + bias
    assert out.shape == (B, d_dim)
    assert jnp.allclose(out, ref, atol=1e-5, rtol=1e-5)

    print("KERNEL_OK")
</pallas_src>

<mosaic_0001>
module attributes {stable_mosaic.version = 11 : i64} {
  func.func @qd_kernel(%arg0: i32, %arg1: memref<8x32xf32, #tpu.memory_space<vmem>>, %arg2: memref<32x128xf32, #tpu.memory_space<vmem>>, %arg3: memref<1x128xf32, #tpu.memory_space<vmem>>, %arg4: memref<8x128xf32, #tpu.memory_space<vmem>>) attributes {dimension_semantics = [#tpu.dimension_semantics<parallel>], iteration_bounds = array<i64: 1>, scalar_prefetch = 0 : i64, scratch_operands = 0 : i64, tpu.core_type = #tpu.core_type<tc>, window_params = [{transform_indices = @transform_0, window_bounds = array<i64: 8, 32>}, {pipeline_mode = #tpu.pipeline_mode<synchronous>, transform_indices = @transform_1, window_bounds = array<i64: 32, 128>}, {pipeline_mode = #tpu.pipeline_mode<synchronous>, transform_indices = @transform_2, window_bounds = array<i64: 1, 128>}, {transform_indices = @transform_3, window_bounds = array<i64: 8, 128>}]} {
    %c0 = arith.constant 0 : index
    %c0_0 = arith.constant 0 : index
    %0 = vector.load %arg1[%c0, %c0_0] : memref<8x32xf32, #tpu.memory_space<vmem>>, vector<8x32xf32>
    %cst = arith.constant 0.000000e+00 : f32
    %1 = vector.broadcast %cst : f32 to vector<8x32xf32>
    %2 = arith.maximumf %0, %1 : vector<8x32xf32>
    %c0_1 = arith.constant 0 : index
    %c0_2 = arith.constant 0 : index
    %3 = vector.load %arg2[%c0_1, %c0_2] : memref<32x128xf32, #tpu.memory_space<vmem>>, vector<32x128xf32>
    %cst_3 = arith.constant dense<0.000000e+00> : vector<8x128xf32>
    %4 = tpu.matmul %2, %3, %cst_3 {dimension_numbers = #tpu.dot_dimension_numbers<[1], [0], [0], [1], [0, 0, 1, 1], [], []>} : vector<8x32xf32>, vector<32x128xf32>, vector<8x128xf32> -> vector<8x128xf32>
    %c0_4 = arith.constant 0 : index
    %c0_5 = arith.constant 0 : index
    %5 = vector.load %arg3[%c0_4, %c0_5] : memref<1x128xf32, #tpu.memory_space<vmem>>, vector<1x128xf32>
    %6 = vector.broadcast %5 : vector<1x128xf32> to vector<8x128xf32>
    %7 = arith.addf %4, %6 : vector<8x128xf32>
    %c0_6 = arith.constant 0 : index
    %c0_7 = arith.constant 0 : index
    %8 = vector.load %arg4[%c0_6, %c0_7] : memref<8x128xf32, #tpu.memory_space<vmem>>, vector<8x128xf32>
    tpu.vector_store %arg4[%c0_6, %c0_7], %7 {strides = array<i32>} : memref<8x128xf32, #tpu.memory_space<vmem>>, vector<8x128xf32>,
    return
  }
  func.func @transform_0(%arg0: i32) -> (i32, i32) {
    %c0_i32 = arith.constant 0 : i32
    %c0_i32_0 = arith.constant 0 : i32
    return %arg0, %c0_i32 : i32, i32
  }
  func.func @transform_1(%arg0: i32) -> (i32, i32) {
    %c0_i32 = arith.constant 0 : i32
    %c0_i32_0 = arith.constant 0 : i32
    %c0_i32_1 = arith.constant 0 : i32
    return %c0_i32, %c0_i32_0 : i32, i32
  }
  func.func @transform_2(%arg0: i32) -> (i32, i32) {
    %c0_i32 = arith.constant 0 : i32
    %c0_i32_0 = arith.constant 0 : i32
    %c0_i32_1 = arith.constant 0 : i32
    return %c0_i32, %c0_i32_0 : i32, i32
  }
  func.func @transform_3(%arg0: i32) -> (i32, i32) {
    %c0_i32 = arith.constant 0 : i32
    %c0_i32_0 = arith.constant 0 : i32
    return %arg0, %c0_i32 : i32, i32
  }
}

</mosaic_0001>

<bundles_post_ra>
// kernel: qd_forward.1
= control target key start
LH: loop header
LB: loop body
LE: loop exit
PB: predicated region body
PF: predicated region fallthrough
CT: control target
= control target key end

     0   :  { %8 = vsyncpa [#allocation3], 0  ;;  %s275_s0 = inlined_call_operand.hbm [shape: f32[8,32], index: 0, kind: input, shape index: {}]   ;;  %s276_s1 = inlined_call_operand.hbm [shape: f32[32,128], index: 1, kind: input, shape index: {}]   ;;  %s277_s2 = inlined_call_operand.vmem [shape: f32[1,128], index: 2, kind: input, shape index: {}]   ;;  %s278_s3 = inlined_call_operand.hbm [shape: f32[8,128], index: 3, kind: output, shape index: {}]  }
   0x1   :  { %9 = vsyncpa [#allocation6], 0 }
   0x2   :  { %10 = vsyncpa [#allocation4], 0  ;;  %s236_s12 = smov [#allocation2]   ;;  %s237_s14 = smov [#allocation5]  }
   0x3   :  { %s17_s13 = sshll.u32 %s236_s12, 4  ;;  %s26_s15 = sshll.u32 %s237_s14, 4  ;;  %s18_s13 = int_to_ptr.vmem [resolvable:$true] %s17_s13  ;;  %s27_s15 = int_to_ptr.vmem [resolvable:$true] %s26_s15 }
   0x4   :  { %s178_s16 = scalar_lea.vmem %s18_s13, 128  ;;  %p183_p1 = scmp.lt.s32.totalorder %s18_s13, %s18_s13 }
   0x5   :  { %p179_p0 = scmp.ne.s32.totalorder %s18_s13, %s178_s16  ;;  %p184_p2 = scmp.lt.s32.totalorder %s178_s16, %s178_s16 }
   0x7   :  { %p185_p3 = por %p184_p2, %p183_p1 }
   0x9   :  { %p186_p4 = pnand %p185_p3, %p179_p0 }
   0xb   :  { %189 = shalt.err (!%p186_p4)
}
   0xc   :  { %20 = dma.hbm_to_vmem [thread:$0]  %s275_s0, 128, %s18_s13, [#allocation3]  }
   0xd   :  { %s198_s19 = scalar_lea.vmem %s27_s15, 512  ;;  %p203_p6 = scmp.lt.s32.totalorder %s27_s15, %s27_s15 }
   0xe   :  { %p199_p5 = scmp.ne.s32.totalorder %s27_s15, %s198_s19  ;;  %p204_p7 = scmp.lt.s32.totalorder %s198_s19, %s198_s19 }
  0x10   :  { %p205_p8 = por %p204_p7, %p203_p6 }
  0x12   :  { %p206_p9 = pnand %p205_p8, %p199_p5 }
  0x14   :  { %209 = shalt.err (!%p206_p9)
}
  0x15   :  { %s238_s20 = smov 128   ;;  %s239_s21 = smov 8  }
  0x16   :  { %32 = dma.hbm_to_vmem [thread:$0]  %s276_s1, 512, %s27_s15, [#allocation6], %s238_s20, %s238_s20, %s239_s21  }
  0x17   :  { %230 = dma.done.wait [#allocation3], 128  }
  0x18   :  { %231 = vsyncadd [#allocation3], 4294967168 }
  0x19   :  { %232 = dma.done.wait [#allocation6], 512  }
  0x1a   :  { %233 = vsyncadd [#allocation6], 4294966784  ;;  %v240_v0 = vmov 0.0   ;;  %vm241_vm0 = vmmov 0   ;;  %v46_v1 = vld [vmem:[#allocation5 + $0x18] sm:$0xff]  ;;  %v45_v2 = vld [vmem:[#allocation5 + $0x10] sm:$0xff] }
  0x1b   :  { %152 = vmatprep.subr.mxu0 %v240_v0  ;;  %160 = vmatprep.mubr.msk.f32.mxu0 %vm241_vm0, %v240_v0  ;;  %v41_v3 = vld [vmem:[#allocation2] sm:$0xff]  ;;  %v44_v4 = vld [vmem:[#allocation5 + $0x8] sm:$0xff]  ;;  %v43_v5 = vld [vmem:[#allocation5] sm:$0xff]  ;;  %vm54_vm1 = vcmask 261120   ;;  %s242_s24 = smov [#allocation7]  }
  0x1c   :  { %153 = vmatpush3.msra.mxu0 %v46_v1  ;;  %v42_v6 = vmax.f32 %v41_v3, 0.0  ;;  %v145_v7 = vld [vmem:[%s277_s2] ss:$0 sm:$0xff]  ;;  %s135_s25 = sshll.u32 %s242_s24, 4  ;;  %s136_s25 = int_to_ptr.vmem [resolvable:$true] %s135_s25 }
  0x1d   :  { %154 = vmatprep.subr.mxu0 %v240_v0  ;;  %s210_s26 = scalar_lea.vmem %s136_s25, 128  ;;  %p215_p11 = scmp.lt.s32.totalorder %s136_s25, %s136_s25 }
  0x1e   :  { %155 = vmatpush3.msra.mxu0 %v45_v2  ;;  %p211_p10 = scmp.ne.s32.totalorder %s136_s25, %s210_s26  ;;  %p216_p12 = scmp.lt.s32.totalorder %s210_s26, %s210_s26 }
  0x1f   :  { %156 = vmatprep.subr.mxu0 %v240_v0 }
  0x20   :  { %157 = vmatpush3.msra.mxu0 %v44_v4  ;;  %p217_p13 = por %p216_p12, %p215_p11 }
  0x21   :  { %158 = vmatprep.subr.mxu0 %v240_v0 }
  0x22   :  { %159 = vmatpush3.msra.mxu0 %v43_v5  ;;  %p218_p0 = pnand %p217_p13, %p211_p10 }
  0x23   :  { %161 = vmatmul.mubr.msk.f32.vlgmr.msra.gmra.mxu0 %vm54_vm1, %v42_v6 }
  0xe3   :  { %v124_v8 = vpop.f32.mrf.mxu0 }
  0xe4   :  { %v125_v9 = vadd.f32 %v145_v7, %v124_v8 }
  0xe5   :  { %v162_v10 = vpop.f32.mrf.mxu0 }
  0xe6   :  { %128 = vst [vmem:[#allocation7] sm:$0xff] %v125_v9 }
  0xe7   :  { %221 = shalt.err (!%p218_p0)
}
  0xe8   :  { %138 = dma.vmem_to_hbm [thread:$0]  %s136_s25, 128, %s278_s3, [#allocation4]  }
  0xe9   :  { %234 = dma.done.wait [#allocation4], 128  }
  0xea   :  { %235 = vsyncadd [#allocation4], 4294967168 }
  0xeb   :  { %142 = vsyncpa [#allocation3], 1 }
  0xec   :  { %143 = vsyncpa [#allocation6], 1 }
  0xed   :  { %144 = vsyncpa [#allocation4], 1 }

</bundles_post_ra>
